<compile_context>
chip_gen: v6e
topology: v6e:2x2x1
jax: 0.10.0
libtpu: 0.0.40
codegen_flags: <defaults>
</compile_context>

<pallas_src>
import jax
import jax.numpy as jnp
from jax.experimental import pallas as pl
from jax.experimental.pallas import tpu as pltpu


_MIN_GRID_STEPS = 4  # keep the pipeline busy / shard the batch axis across v7x cores


def _vmem_budgets():
    """(tile_budget_bytes, vmem_limit_bytes), generation-aware."""
    cap = None
    try:
        cap = int(getattr(pltpu.get_tpu_info(), "vmem_capacity_bytes", 0)) or None
    except Exception:
        cap = None  # query unavailable -> conservative (v7x-safe) defaults
    if cap is not None and cap >= 96 * 1024 * 1024:
        # v5e / v6e: 128 MiB physical VMEM -> bigger tiles amortize per-step overhead.
        return 48 * 1024 * 1024, 72 * 1024 * 1024
    # v7x (64 MiB per TensorCore) or unknown: stay conservative.
    return 16 * 1024 * 1024, 32 * 1024 * 1024


def _choose_batch_tile(B, C, HW, itemsize, w_bytes, budget):
    """Largest batch tile (>=8 preferred) whose double-buffered in+out tiles fit the
    budget, while keeping >= _MIN_GRID_STEPS grid steps whenever B allows it."""

    def tile_bytes(b):  # 2 double-buffered copies each of the input and output tile
        return 4 * b * C * HW * itemsize + w_bytes

    bt = 8
    while (bt * 2 <= B
           and pl.cdiv(B, bt * 2) >= _MIN_GRID_STEPS
           and tile_bytes(bt * 2) <= budget):
        bt *= 2
    while bt > 1 and tile_bytes(bt) > budget:
        bt //= 2
    if tile_bytes(bt) > budget:
        # TODO(synk): two-pass H*W-tiled reduce+scale for activations where even a
        # single-row (1, C, H*W) tile exceeds the VMEM budget (huge stem layers).
        raise NotImplementedError(
            f"SEBlock tile (1, {C}, {HW}) x{itemsize}B exceeds the VMEM tile budget "
            f"({budget} bytes); needs an H*W-tiled two-pass kernel.")
    return bt


def _make_se_kernel(hw):
    inv_hw = 1.0 / float(hw)

    def kernel(x_ref, w1a_ref, w1m_ref, w2t_ref, o_ref):
        # x_ref / o_ref: (Bt, C, HW) in the input dtype; HW is the full spatial
        # extent, so there are no padding lanes and no max-pool mask is needed.
        # w1a_ref / w1m_ref: (C, hidden) f32;  w2t_ref: (hidden, C) f32.

        # Squeeze: global average (f32 accumulation) + global max over the lane axis.
        avg_y = jnp.sum(x_ref[...], axis=-1, dtype=jnp.float32) * inv_hw   # (Bt, C)
        max_y = jnp.max(x_ref[...], axis=-1).astype(jnp.float32)           # (Bt, C)

        # Excitation: Linear(2C -> hid, no bias) in split form (no lane-axis concat),
        # ReLU, Linear(hid -> C, no bias), Sigmoid.  All f32 on the MXU / EUP.
        h = (jnp.dot(avg_y, w1a_ref[...], preferred_element_type=jnp.float32)
             + jnp.dot(max_y, w1m_ref[...], preferred_element_type=jnp.float32))
        h = jnp.maximum(h, 0.0)
        s = jax.nn.sigmoid(jnp.dot(h, w2t_ref[...], preferred_element_type=jnp.float32))

        # Scale: re-read x_ref (short live ranges), cast the tiny gate down instead of
        # upcasting the whole block, fused multiply + lane-dense store.
        gate = s.astype(o_ref.dtype)[:, :, None]                           # (Bt, C, 1)
        o_ref[...] = (x_ref[...] * gate).astype(o_ref.dtype)

    return kernel


def se_block(x_nchw, w1, w2):
    """SEBlock forward.

    x_nchw: (B, C, H, W)
    w1: (C // reduction, 2*C)   -- nn.Linear(channel*2, channel//reduction, bias=False)
    w2: (C, C // reduction)     -- nn.Linear(channel//reduction, channel, bias=False)
    """
    B, C, H, W = x_nchw.shape
    hidden = w1.shape[0]
    assert hidden >= 1 and w1.shape == (hidden, 2 * C) and w2.shape == (C, hidden)
    HW = H * W

    # Pre-transpose + split w1 once in the wrapper (no in-kernel .T / concat).
    w1t = jnp.asarray(w1, jnp.float32).T          # (2C, hidden)
    w1t_avg, w1t_max = w1t[:C], w1t[C:]           # (C, hidden) each
    w2t = jnp.asarray(w2, jnp.float32).T          # (hidden, C)
    w_bytes = (w1t.size + w2t.size) * 4

    itemsize = jnp.dtype(x_nchw.dtype).itemsize
    budget, vmem_limit = _vmem_budgets()
    bt = _choose_batch_tile(B, C, HW, itemsize, w_bytes, budget)
    num_steps = pl.cdiv(B, bt)

    # Free reshape (contiguous): flatten spatial onto the lane axis.
    # TODO(synk): for very small C (< sublane pack factor) fold batch onto the
    # sublane axis ((B*C, HW) tiling) to fill vregs during the streaming scale pass.
    x_flat = x_nchw.reshape(B, C, HW)

    cost = pl.CostEstimate(
        flops=3 * B * C * HW + 2 * B * (2 * C) * hidden + 2 * B * hidden * C,
        transcendentals=B * C,                     # sigmoid
        bytes_accessed=2 * B * C * HW * itemsize + w_bytes,
    )

    out = pl.pallas_call(
        _make_se_kernel(HW),
        out_shape=jax.ShapeDtypeStruct((B, C, HW), x_nchw.dtype),
        grid=(num_steps,),
        in_specs=[
            # x: tiled over batch only; last two dims are the full (C, HW) extents,
            # so no wrapper padding / slicing and no in-kernel mask are needed.  The
            # ragged final batch block (B % bt != 0) reads unspecified rows, but all
            # ops are row-independent and those output rows are never written back.
            pl.BlockSpec((bt, C, HW), lambda b: (b, 0, 0)),
            pl.BlockSpec((C, hidden), lambda b: (0, 0)),     # w1^T avg half: resident
            pl.BlockSpec((C, hidden), lambda b: (0, 0)),     # w1^T max half: resident
            pl.BlockSpec((hidden, C), lambda b: (0, 0)),     # w2^T: resident
        ],
        out_specs=pl.BlockSpec((bt, C, HW), lambda b: (b, 0, 0)),
        compiler_params=pltpu.CompilerParams(
            dimension_semantics=("parallel",),
            vmem_limit_bytes=vmem_limit,
        ),
        cost_estimate=cost,
    )(x_flat, w1t_avg, w1t_max, w2t)

    return out.reshape(B, C, H, W)


def se_block_ref(x, w1, w2):
    """Pure-JAX reference matching the PyTorch forward."""
    avg_y = jnp.mean(x, axis=(2, 3))
    max_y = jnp.max(x, axis=(2, 3))
    y = jnp.concatenate([avg_y, max_y], axis=1)
    h = jnp.maximum(y @ w1.T, 0.0)
    s = jax.nn.sigmoid(h @ w2.T)
    return x * s[:, :, None, None]


def _run_case(key, B, C, H, W, reduction):
    hidden = max(C // reduction, 1)
    kx, k1, k2 = jax.random.split(key, 3)
    x = jax.random.normal(kx, (B, C, H, W), dtype=jnp.float32)
    # nn.Linear weight layout: (out_features, in_features), no bias.
    w1 = jax.random.normal(k1, (hidden, 2 * C), dtype=jnp.float32) * 0.2
    w2 = jax.random.normal(k2, (C, hidden), dtype=jnp.float32) * 0.2
    out = jax.block_until_ready(se_block(x, w1, w2))
    ref = se_block_ref(x, w1, w2)
    assert out.shape == (B, C, H, W)
    assert jnp.allclose(out, ref, atol=1e-5, rtol=1e-5), (B, C, H, W)


if __name__ == "__main__":
    key = jax.random.PRNGKey(0)
    k0, k1, k2 = jax.random.split(key, 3)
    # Primary small case from the module spec.
    _run_case(k0, B=2, C=4, H=16, W=16, reduction=4)
    # Ragged batch block (B % bt != 0) with H*W not a multiple of 128 (masked vst path).
    _run_case(k1, B=3, C=4, H=5, W=7, reduction=4)
    # Multi-step grid with a ragged final batch block.
    _run_case(k2, B=20, C=8, H=16, W=16, reduction=4)
    print("KERNEL_OK")
</pallas_src>

<mosaic_0001>
module attributes {stable_mosaic.version = 11 : i64} {
  func.func @kernel(%arg0: i32, %arg1: memref<8x4x256xf32, #tpu.memory_space<vmem>>, %arg2: memref<4x1xf32, #tpu.memory_space<vmem>>, %arg3: memref<4x1xf32, #tpu.memory_space<vmem>>, %arg4: memref<1x4xf32, #tpu.memory_space<vmem>>, %arg5: memref<8x4x256xf32, #tpu.memory_space<vmem>>) attributes {dimension_semantics = [#tpu.dimension_semantics<parallel>], iteration_bounds = array<i64: 1>, scalar_prefetch = 0 : i64, scratch_operands = 0 : i64, tpu.core_type = #tpu.core_type<tc>, window_params = [{transform_indices = @transform_0, window_bounds = array<i64: 8, 4, 256>}, {pipeline_mode = #tpu.pipeline_mode<synchronous>, transform_indices = @transform_1, window_bounds = array<i64: 4, 1>}, {pipeline_mode = #tpu.pipeline_mode<synchronous>, transform_indices = @transform_2, window_bounds = array<i64: 4, 1>}, {pipeline_mode = #tpu.pipeline_mode<synchronous>, transform_indices = @transform_3, window_bounds = array<i64: 1, 4>}, {transform_indices = @transform_4, window_bounds = array<i64: 8, 4, 256>}]} {
    %c0 = arith.constant 0 : index
    %c0_0 = arith.constant 0 : index
    %c0_1 = arith.constant 0 : index
    %0 = vector.load %arg1[%c0, %c0_0, %c0_1] : memref<8x4x256xf32, #tpu.memory_space<vmem>>, vector<8x4x256xf32>
    %cst = arith.constant dense<0.000000e+00> : vector<8x4xf32>
    %1 = vector.multi_reduction <add>, %0, %cst [2] : vector<8x4x256xf32> to vector<8x4xf32>
    %cst_2 = arith.constant 3.906250e-03 : f32
    %2 = vector.broadcast %cst_2 : f32 to vector<8x4xf32>
    %3 = arith.mulf %1, %2 : vector<8x4xf32>
    %c0_3 = arith.constant 0 : index
    %c0_4 = arith.constant 0 : index
    %c0_5 = arith.constant 0 : index
    %4 = vector.load %arg1[%c0_3, %c0_4, %c0_5] : memref<8x4x256xf32, #tpu.memory_space<vmem>>, vector<8x4x256xf32>
    %cst_6 = arith.constant dense<0xFF800000> : vector<8x4xf32>
    %5 = vector.multi_reduction <maximumf>, %4, %cst_6 [2] : vector<8x4x256xf32> to vector<8x4xf32>
    %c0_7 = arith.constant 0 : index
    %c0_8 = arith.constant 0 : index
    %6 = vector.load %arg2[%c0_7, %c0_8] : memref<4x1xf32, #tpu.memory_space<vmem>>, vector<4x1xf32>
    %cst_9 = arith.constant dense<0.000000e+00> : vector<8x1xf32>
    %7 = tpu.matmul %3, %6, %cst_9 {dimension_numbers = #tpu.dot_dimension_numbers<[1], [0], [0], [1], [0, 0, 1, 1], [], []>} : vector<8x4xf32>, vector<4x1xf32>, vector<8x1xf32> -> vector<8x1xf32>
    %c0_10 = arith.constant 0 : index
    %c0_11 = arith.constant 0 : index
    %8 = vector.load %arg3[%c0_10, %c0_11] : memref<4x1xf32, #tpu.memory_space<vmem>>, vector<4x1xf32>
    %cst_12 = arith.constant dense<0.000000e+00> : vector<8x1xf32>
    %9 = tpu.matmul %5, %8, %cst_12 {dimension_numbers = #tpu.dot_dimension_numbers<[1], [0], [0], [1], [0, 0, 1, 1], [], []>} : vector<8x4xf32>, vector<4x1xf32>, vector<8x1xf32> -> vector<8x1xf32>
    %10 = arith.addf %7, %9 : vector<8x1xf32>
    %cst_13 = arith.constant 0.000000e+00 : f32
    %11 = vector.broadcast %cst_13 : f32 to vector<8x1xf32>
    %12 = arith.maximumf %10, %11 : vector<8x1xf32>
    %c0_14 = arith.constant 0 : index
    %c0_15 = arith.constant 0 : index
    %13 = vector.load %arg4[%c0_14, %c0_15] : memref<1x4xf32, #tpu.memory_space<vmem>>, vector<1x4xf32>
    %cst_16 = arith.constant dense<0.000000e+00> : vector<8x4xf32>
    %14 = tpu.matmul %12, %13, %cst_16 {dimension_numbers = #tpu.dot_dimension_numbers<[1], [0], [0], [1], [0, 0, 1, 1], [], []>} : vector<8x1xf32>, vector<1x4xf32>, vector<8x4xf32> -> vector<8x4xf32>
    %15 = arith.negf %14 : vector<8x4xf32>
    %16 = math.exp %15 : vector<8x4xf32>
    %cst_17 = arith.constant 1.000000e+00 : f32
    %17 = vector.broadcast %cst_17 : f32 to vector<8x4xf32>
    %18 = arith.addf %17, %16 : vector<8x4xf32>
    %19 = arith.divf %17, %18 : vector<8x4xf32>
    %20 = vector.shape_cast %19 : vector<8x4xf32> to vector<8x4x1xf32>
    %c0_18 = arith.constant 0 : index
    %c0_19 = arith.constant 0 : index
    %c0_20 = arith.constant 0 : index
    %21 = vector.load %arg1[%c0_18, %c0_19, %c0_20] : memref<8x4x256xf32, #tpu.memory_space<vmem>>, vector<8x4x256xf32>
    %22 = vector.broadcast %20 : vector<8x4x1xf32> to vector<8x4x256xf32>
    %23 = arith.mulf %21, %22 : vector<8x4x256xf32>
    %c0_21 = arith.constant 0 : index
    %c0_22 = arith.constant 0 : index
    %c0_23 = arith.constant 0 : index
    %24 = vector.load %arg5[%c0_21, %c0_22, %c0_23] : memref<8x4x256xf32, #tpu.memory_space<vmem>>, vector<8x4x256xf32>
    tpu.vector_store %arg5[%c0_21, %c0_22, %c0_23], %23 {strides = array<i32>} : memref<8x4x256xf32, #tpu.memory_space<vmem>>, vector<8x4x256xf32>,
    return
  }
  func.func @transform_0(%arg0: i32) -> (i32, i32, i32) {
    %c0_i32 = arith.constant 0 : i32
    %c0_i32_0 = arith.constant 0 : i32
    %c0_i32_1 = arith.constant 0 : i32
    return %arg0, %c0_i32, %c0_i32_0 : i32, i32, i32
  }
  func.func @transform_1(%arg0: i32) -> (i32, i32) {
    %c0_i32 = arith.constant 0 : i32
    %c0_i32_0 = arith.constant 0 : i32
    %c0_i32_1 = arith.constant 0 : i32
    return %c0_i32, %c0_i32_0 : i32, i32
  }
  func.func @transform_2(%arg0: i32) -> (i32, i32) {
    %c0_i32 = arith.constant 0 : i32
    %c0_i32_0 = arith.constant 0 : i32
    %c0_i32_1 = arith.constant 0 : i32
    return %c0_i32, %c0_i32_0 : i32, i32
  }
  func.func @transform_3(%arg0: i32) -> (i32, i32) {
    %c0_i32 = arith.constant 0 : i32
    %c0_i32_0 = arith.constant 0 : i32
    %c0_i32_1 = arith.constant 0 : i32
    return %c0_i32, %c0_i32_0 : i32, i32
  }
  func.func @transform_4(%arg0: i32) -> (i32, i32, i32) {
    %c0_i32 = arith.constant 0 : i32
    %c0_i32_0 = arith.constant 0 : i32
    %c0_i32_1 = arith.constant 0 : i32
    return %arg0, %c0_i32, %c0_i32_0 : i32, i32, i32
  }
}

</mosaic_0001>

<bundles_post_ra>
// kernel: tpu_custom_call.1
= control target key start
LH: loop header
LB: loop body
LE: loop exit
PB: predicated region body
PF: predicated region fallthrough
CT: control target
= control target key end

     0   :  { %9 = vsyncpa [#allocation3], 0  ;;  %s925_s0 = inlined_call_operand.hbm [shape: f32[2,4,256], index: 0, kind: input, shape index: {}]   ;;  %s926_s1 = inlined_call_operand.vmem [shape: f32[4,1], index: 1, kind: input, shape index: {}]   ;;  %s927_s2 = inlined_call_operand.vmem [shape: f32[4,1], index: 2, kind: input, shape index: {}]   ;;  %s928_s3 = inlined_call_operand.vmem [shape: f32[1,4], index: 3, kind: input, shape index: {}]   ;;  %s929_s4 = inlined_call_operand.hbm [shape: f32[2,4,256], index: 4, kind: output, shape index: {}]  }
   0x1   :  { %10 = vsyncpa [#allocation4], 0 }
   0x2   :  { %15 = vsyncadd [#allocation3], 768  ;;  %s747_s15 = smov [#allocation2]  }
   0x3   :  { %s16_s16 = sshll.u32 %s747_s15, 4  ;;  %s17_s16 = int_to_ptr.vmem [resolvable:$true] %s16_s16 }
   0x4   :  { %s711_s17 = scalar_lea.vmem %s17_s16, 256  ;;  %s715_s18 = scalar_lea.vmem %s17_s16, 1024 }
   0x5   :  { %p712_p0 = scmp.ne.s32.totalorder %s17_s16, %s711_s17  ;;  %p716_p1 = scmp.lt.s32.totalorder %s17_s16, %s17_s16 }
   0x6   :  { %p717_p2 = scmp.lt.s32.totalorder %s715_s18, %s711_s17 }
   0x8   :  { %p718_p3 = por %p717_p2, %p716_p1 }
   0xa   :  { %p719_p4 = pnand %p718_p3, %p712_p0 }
   0xc   :  { %722 = shalt.err (!%p719_p4)
}
   0xd   :  { %s748_s19 = smov 128   ;;  %s749_s20 = smov 8  }
   0xe   :  { %22 = dma.hbm_to_vmem [thread:$0]  %s925_s0, 256, %s17_s16, [#allocation3], %s748_s19, %s748_s19, %s749_s20  }
   0xf   :  { %743 = dma.done.wait [#allocation3], 1024  }
  0x10   :  { %744 = vsyncadd [#allocation3], 4294966272  ;;  %vm64_vm0 = vcmask 1043456   ;;  %v785_v0 = vld [vmem:[#allocation2 + $0x10] sm:$0xff]  ;;  %v787_v1 = vld [vmem:[#allocation2] sm:$0xff]  ;;  %vm751_vm1 = vmmov 0  }
  0x11   :  { %v789_v2 = vld [vmem:[#allocation2 + $0x18] sm:$0xff]  ;;  %v50_v3 = vcombine.high %v785_v0, %v785_v0  ;;  %v75_v4 = vsel %vm64_vm0, %v785_v0, 0.0  ;;  %v48_v5 = vcombine.high %v787_v1, %v787_v1  ;;  %v65_v6 = vsel %vm64_vm0, %v787_v1, 0.0  ;;  %v799_v7 = vld [vmem:[#allocation2 + $0x8] sm:$0xff]  ;;  %v813_v18 = vld [vmem:[#allocation2 + $0x20] sm:$0xff] }
  0x12   :  { %v51_v8 = vcombine.high %v789_v2, %v789_v2  ;;  %v49_v9 = vcombine.high %v799_v7, %v799_v7  ;;  %v80_v12 = vsel %vm64_vm0, %v789_v2, 0.0  ;;  %v70_v13 = vsel %vm64_vm0, %v799_v7, 0.0  ;;  %v823_v26 = vld [vmem:[#allocation2 + $0x28] sm:$0xff]  ;;  %v833_v34 = vld [vmem:[#allocation2 + $0x30] sm:$0xff]  ;;  %v843_v42 = vld [vmem:[#allocation2 + $0x38] sm:$0xff] }
  0x13   :  { %v76_v10 = vsel %vm64_vm0, %v50_v3, 0.0  ;;  %v66_v11 = vsel %vm64_vm0, %v48_v5, 0.0  ;;  %v118_v21 = vsel %vm64_vm0, %v799_v7, -inf  ;;  %v113_v23 = vsel %vm64_vm0, %v787_v1, -inf }
  0x14   :  { %v77_v14 = vadd.f32 %v76_v10, %v75_v4  ;;  %v67_v15 = vadd.f32 %v66_v11, %v65_v6  ;;  %v81_v16 = vsel %vm64_vm0, %v51_v8, 0.0  ;;  %v71_v17 = vsel %vm64_vm0, %v49_v9, 0.0  ;;  %v153_v4 = vld [vmem:[%s926_s1] sm:$0xf] }
  0x15   :  { %v82_v19 = vadd.f32 %v81_v16, %v80_v12  ;;  %v72_v20 = vadd.f32 %v71_v17, %v70_v13  ;;  %v119_v22 = vsel %vm64_vm0, %v49_v9, -inf  ;;  %v114_v24 = vsel %vm64_vm0, %v48_v5, -inf  ;;  %v154_v5 = vld [vmem:[%s927_s2] sm:$0xf] }
  0x16   :  { %78 = vadd.xlane.f32.xlu1 %v77_v14  ;;  %68 = vadd.xlane.f32.xlu0 %v67_v15  ;;  %v52_v25 = vcombine.high %v813_v18, %v813_v18  ;;  %v120_v27 = vmax.f32 %v118_v21, %v119_v22  ;;  %v115_v28 = vmax.f32 %v113_v23, %v114_v24  ;;  %v123_v29 = vsel %vm64_vm0, %v785_v0, -inf }
  0x17   :  { %v124_v30 = vsel %vm64_vm0, %v50_v3, -inf  ;;  %v85_v31 = vsel %vm64_vm0, %v813_v18, 0.0  ;;  %v53_v33 = vcombine.high %v823_v26, %v823_v26  ;;  %v128_v37 = vsel %vm64_vm0, %v789_v2, -inf }
  0x18   :  { %v86_v32 = vsel %vm64_vm0, %v52_v25, 0.0  ;;  %v125_v35 = vmax.f32 %v123_v29, %v124_v30  ;;  %v129_v38 = vsel %vm64_vm0, %v51_v8, -inf  ;;  %v90_v39 = vsel %vm64_vm0, %v823_v26, 0.0 }
  0x19   :  { %v87_v36 = vadd.f32 %v86_v32, %v85_v31  ;;  %v91_v40 = vsel %vm64_vm0, %v53_v33, 0.0  ;;  %v54_v41 = vcombine.high %v833_v34, %v833_v34  ;;  %v130_v43 = vmax.f32 %v128_v37, %v129_v38 }
  0x1a   :  { %83 = vadd.xlane.f32.xlu1 %v82_v19  ;;  %73 = vadd.xlane.f32.xlu0 %v72_v20  ;;  %v92_v44 = vadd.f32 %v91_v40, %v90_v39  ;;  %v133_v45 = vsel %vm64_vm0, %v813_v18, -inf  ;;  %v134_v46 = vsel %vm64_vm0, %v52_v25, -inf  ;;  %v95_v47 = vsel %vm64_vm0, %v833_v34, 0.0 }
  0x1b   :  { %v96_v48 = vsel %vm64_vm0, %v54_v41, 0.0  ;;  %v55_v49 = vcombine.high %v843_v42, %v843_v42  ;;  %v135_v50 = vmax.f32 %v133_v45, %v134_v46  ;;  %v138_v52 = vsel %vm64_vm0, %v823_v26, -inf }
  0x1c   :  { %v97_v51 = vadd.f32 %v96_v48, %v95_v47  ;;  %v139_v53 = vsel %vm64_vm0, %v53_v33, -inf  ;;  %v100_v54 = vsel %vm64_vm0, %v843_v42, 0.0  ;;  %v143_v58 = vsel %vm64_vm0, %v833_v34, -inf }
  0x1d   :  { %v101_v55 = vsel %vm64_vm0, %v55_v49, 0.0  ;;  %v140_v56 = vmax.f32 %v138_v52, %v139_v53  ;;  %v144_v59 = vsel %vm64_vm0, %v54_v41, -inf  ;;  %v148_v60 = vsel %vm64_vm0, %v843_v42, -inf }
  0x1e   :  { %121 = vmax.xlane.f32.xlu1 %v120_v27  ;;  %116 = vmax.xlane.f32.xlu0 %v115_v28  ;;  %v102_v57 = vadd.f32 %v101_v55, %v100_v54  ;;  %v149_v61 = vsel %vm64_vm0, %v55_v49, -inf  ;;  %v145_v62 = vmax.f32 %v143_v58, %v144_v59  ;;  %v750_v3 = vmov 0.0  }
  0x1f   :  { %v150_v63 = vmax.f32 %v148_v60, %v149_v61  ;;  %674 = vmatprep.subr.mxu1 %v750_v3  ;;  %669 = vmatprep.subr.mxu0 %v750_v3  ;;  %v163_v11 = vlaneseq  ;;  %vm197_vm2 = vcmask 1041409   ;;  %vm199_vm3 = vcmask 1042434  }
  0x20   :  { %675 = vmatpush3.msk.msra.mxu1 %vm64_vm0, %v153_v4  ;;  %676 = vmatprep.mubr.msk.f32.mxu1 %vm751_vm1, %v750_v3  ;;  %vm201_vm4 = vcmask 1043459   ;;  %vm203_vm5 = vcmask 1044484   ;;  %vm205_vm6 = vcmask 1045509   ;;  %vm207_vm7 = vcmask 1046534  }
  0x21   :  { %671 = vmatprep.mubr.msk.f32.mxu0 %vm751_vm1, %v750_v3  ;;  %670 = vmatpush3.msk.msra.mxu0 %vm64_vm0, %v154_v5  ;;  %v164_v14 = vand.u32 127, %v163_v11  ;;  %v880_v15 = vshrl.u32 %v163_v11, 7  ;;  %vm209_vm8 = vcmask 1047559   ;;  %vm211_vm9 = vcmask 31744  }
  0x22   :  { %126 = vmax.xlane.f32.xlu1 %v125_v35  ;;  %88 = vadd.xlane.f32.xlu0 %v87_v36  ;;  %vm415_vm10 = vcmask 1040384   ;;  %vm411_vm11 = vcmask 7168  }
  0x23   :  { %679 = vmatprep.subr.mxu0 %v750_v3  ;;  %v167_v20 = vsub.s32 %v164_v14, %v880_v15 }
  0x26   :  { %131 = vmax.xlane.f32.xlu1 %v130_v43  ;;  %93 = vadd.xlane.f32.xlu0 %v92_v44 }
  0x2a   :  { %136 = vmax.xlane.f32.xlu1 %v135_v50  ;;  %98 = vadd.xlane.f32.xlu0 %v97_v51 }
  0x2e   :  { %141 = vmax.xlane.f32.xlu1 %v140_v56  ;;  %103 = vadd.xlane.f32.xlu0 %v102_v57 }
  0x32   :  { %146 = vmax.xlane.f32.xlu0 %v145_v62  ;;  %151 = vmax.xlane.f32.xlu1 %v150_v63 }
  0x9f   :  { %v79_v6 = vpop.xlane.xlu1 %78  ;;  %v69_v8 = vpop.xlane.xlu0 %68 }
  0xa0   :  { %v105_v21 = vmul.f32 0.00390625, %v69_v8  ;;  %v107_v23 = vmul.f32 0.00390625, %v79_v6 }
  0xa2   :  { %v298_v27 = vrot.slane %v105_v21, %v167_v20  ;;  %v306_v32 = vrot.slane %v107_v23, %v167_v20  ;;  %v504_v23 = vsub.s32 1, %v880_v15 }
  0xa3   :  { %v84_v9 = vpop.xlane.xlu1 %83  ;;  %v74_v10 = vpop.xlane.xlu0 %73 }
  0xa4   :  { %v106_v16 = vmul.f32 0.00390625, %v74_v10  ;;  %v108_v28 = vmul.f32 0.00390625, %v84_v9  ;;  %v410_v10 = vld [vmem:[%s928_s3] sm:$0x1] }
  0xa6   :  { %v302_v22 = vrot.slane %v106_v16, %v167_v20  ;;  %v310_v36 = vrot.slane %v108_v28, %v167_v20 }
  0xa7   :  { %v122_v12 = vpop.xlane.xlu1 %121  ;;  %v117_v13 = vpop.xlane.xlu0 %116 }
  0xa8   :  { %v327_v30 = vsel %vm197_vm2, %v302_v22, %v298_v27  ;;  %v172_v38 = vrot.slane %v122_v12, %v167_v20  ;;  %v168_v39 = vrot.slane %v117_v13, %v167_v20 }
  0xa9   :  { %v328_v40 = vsel %vm199_vm3, %v306_v32, %v327_v30  ;;  %v525_v30 = vsub.s32 4, %v880_v15 }
  0xaa   :  { %v329_v49 = vsel %vm201_vm4, %v310_v36, %v328_v40  ;;  %v198_v52 = vsel %vm197_vm2, %v172_v38, %v168_v39  ;;  %v532_v38 = vsub.s32 5, %v880_v15  ;;  %v546_v40 = vsub.s32 7, %v880_v15 }
  0xab   :  { %v127_v17 = vpop.xlane.xlu1 %126  ;;  %v89_v19 = vpop.xlane.xlu0 %88 }
  0xac   :  { %v109_v29 = vmul.f32 0.00390625, %v89_v19  ;;  %v176_v43 = vrot.slane %v127_v17, %v167_v20 }
  0xae   :  { %v314_v41 = vrot.slane %v109_v29, %v167_v20  ;;  %v200_v55 = vsel %vm199_vm3, %v176_v43, %v198_v52  ;;  %v511_v29 = vsub.s32 2, %v880_v15  ;;  %v752_v43 = vmov 839922192  }
  0xaf   :  { %v132_v24 = vpop.xlane.xlu1 %131  ;;  %v94_v25 = vpop.xlane.xlu0 %93 }
  0xb0   :  { %v110_v31 = vmul.f32 0.00390625, %v94_v25  ;;  %v180_v45 = vrot.slane %v132_v24, %v167_v20  ;;  %v330_v53 = vsel %vm203_vm5, %v314_v41, %v329_v49  ;;  %v497_v24 = vsub.s32 0, %v880_v15 }
  0xb2   :  { %v318_v44 = vrot.slane %v110_v31, %v167_v20  ;;  %v202_v58 = vsel %vm201_vm4, %v180_v45, %v200_v55 }
  0xb3   :  { %v137_v33 = vpop.xlane.xlu1 %136  ;;  %v99_v35 = vpop.xlane.xlu0 %98 }
  0xb4   :  { %v111_v37 = vmul.f32 0.00390625, %v99_v35  ;;  %v184_v50 = vrot.slane %v137_v33, %v167_v20  ;;  %v331_v56 = vsel %vm205_vm6, %v318_v44, %v330_v53  ;;  %v518_v33 = vsub.s32 3, %v880_v15 }
  0xb5   :  { %v539_v35 = vsub.s32 6, %v880_v15  ;;  %v560_v44 = vunpack.c.l.s4 %v752_v43 }
  0xb6   :  { %v322_v46 = vrot.slane %v111_v37, %v167_v20  ;;  %v204_v62 = vsel %vm203_vm5, %v184_v50, %v202_v58 }
  0xb7   :  { %v142_v47 = vpop.xlane.xlu1 %141  ;;  %v104_v48 = vpop.xlane.xlu0 %103  ;;  %v561_v45 = vunpack.c.0.s8 %v560_v44 }
  0xb8   :  { %v112_v51 = vmul.f32 0.00390625, %v104_v48  ;;  %v188_v54 = vrot.slane %v142_v47, %v167_v20  ;;  %v332_v61 = vsel %vm207_vm7, %v322_v46, %v331_v56 }
  0xb9   :  { %v564_v46 = vsub.s32 %v561_v45, %v880_v15 }
  0xba   :  { %v326_v57 = vrot.slane %v112_v51, %v167_v20  ;;  %v206_v6 = vsel %vm205_vm6, %v188_v54, %v204_v62 }
  0xbb   :  { %v147_v59 = vpop.xlane.xlu0 %146  ;;  %v152_v60 = vpop.xlane.xlu1 %151 }
  0xbc   :  { %v192_v63 = vrot.slane %v147_v59, %v167_v20  ;;  %v196_v4 = vrot.slane %v152_v60, %v167_v20  ;;  %v333_v5 = vsel %vm209_vm8, %v326_v57, %v332_v61 }
  0xbd   :  { %677 = vmatmul.mubr.msk.f32.vlgmr.msra.gmra.mxu1 %vm211_vm9, %v333_v5 }
  0xbe   :  { %v208_v8 = vsel %vm207_vm7, %v192_v63, %v206_v6 }
  0xbf   :  { %v210_v9 = vsel %vm209_vm8, %v196_v4, %v208_v8 }
  0xc0   :  { %672 = vmatmul.mubr.msk.f32.vlgmr.msra.gmra.mxu0 %vm211_vm9, %v210_v9 }
  0xc1   :  { %681 = vmatprep.mubr.msk.f32.mxu0 %vm751_vm1, %v750_v3  ;;  %680 = vmatpush3.msk.msra.mxu0 %vm415_vm10, %v410_v10 }
 0x17d   :  { %v405_v11 = vpop.f32.mrf.mxu1 }
 0x17f   :  { %v678_v12 = vpop.f32.mrf.mxu1 }
 0x180   :  { %v283_v13 = vpop.f32.mrf.mxu0 }
 0x181   :  { %v406_v14 = vadd.f32 %v405_v11, %v283_v13 }
 0x182   :  { %v673_v16 = vpop.f32.mrf.mxu0 }
 0x183   :  { %v409_v17 = vmax.f32 %v406_v14, 0.0 }
 0x185   :  { %682 = vmatmul.mubr.msk.f32.vlgmr.msra.gmra.mxu0 %vm411_vm11, %v409_v17 }
 0x245   :  { %v485_v19 = vpop.f32.mrf.mxu0 }
 0x246   :  { %v662_v20 = vmul.f32 -1.442695, %v485_v19 }
 0x247   :  { %v683_v21 = vpop.f32.mrf.mxu0 }
 0x248   :  { %699 = vpow2.f32 %v662_v20 }
 0x255   :  { %v700_v22 = vpop.eup %699 }
 0x256   :  { %v492_v3 = vadd.f32 1.0, %v700_v22 }
 0x258   :  { %701 = vrcp.f32 %v492_v3 }
 0x265   :  { %v702_v25 = vpop.eup %701 }
 0x266   :  { %v505_v27 = vrot.slane %v702_v25, %v504_v23  ;;  %v498_v28 = vrot.slane %v702_v25, %v497_v24  ;;  %v512_v31 = vrot.slane %v702_v25, %v511_v29  ;;  %v526_v32 = vrot.slane %v702_v25, %v525_v30 }
 0x267   :  { %v519_v36 = vrot.slane %v702_v25, %v518_v33  ;;  %v540_v37 = vrot.slane %v702_v25, %v539_v35  ;;  %v533_v39 = vrot.slane %v702_v25, %v532_v38  ;;  %v547_v41 = vrot.slane %v702_v25, %v546_v40 }
 0x268   :  { %507 = vbcast.lane.b32.xlu1 %v505_v27, 256  ;;  %500 = vbcast.lane.b32.xlu0 %v498_v28, 256 }
 0x26c   :  { %514 = vbcast.lane.b32.xlu1 %v512_v31, 256  ;;  %528 = vbcast.lane.b32.xlu0 %v526_v32, 256 }
 0x270   :  { %521 = vbcast.lane.b32.xlu1 %v519_v36, 256  ;;  %542 = vbcast.lane.b32.xlu0 %v540_v37, 256 }
 0x274   :  { %535 = vbcast.lane.b32.xlu1 %v533_v39, 256 }
 0x278   :  { %549 = vbcast.lane.b32.xlu1 %v547_v41, 256 }
 0x2da   :  { %v508_v47 = vpop.permute.xlu1 %507  ;;  %v501_v48 = vpop.permute.xlu0 %500 }
 0x2db   :  { %v572_v49 = vrot.slane %v508_v47, %v564_v46  ;;  %v565_v50 = vrot.slane %v501_v48, %v564_v46 }
 0x2dd   :  { %v624_v51 = vmul.f32 %v572_v49, %v799_v7  ;;  %v623_v52 = vmul.f32 %v565_v50, %v787_v1 }
 0x2de   :  { %v515_v53 = vpop.permute.xlu1 %514  ;;  %v529_v54 = vpop.permute.xlu0 %528 }
 0x2df   :  { %632 = vst [vmem:[#allocation5 + $0x8] sm:$0xff] %v624_v51  ;;  %631 = vst [vmem:[#allocation5] sm:$0xff] %v623_v52  ;;  %v579_v55 = vrot.slane %v515_v53, %v564_v46  ;;  %v593_v56 = vrot.slane %v529_v54, %v564_v46 }
 0x2e1   :  { %v625_v57 = vmul.f32 %v579_v55, %v785_v0  ;;  %v627_v58 = vmul.f32 %v593_v56, %v813_v18 }
 0x2e2   :  { %v522_v59 = vpop.permute.xlu1 %521  ;;  %v543_v15 = vpop.permute.xlu0 %542 }
 0x2e3   :  { %633 = vst [vmem:[#allocation5 + $0x10] sm:$0xff] %v625_v57  ;;  %635 = vst [vmem:[#allocation5 + $0x20] sm:$0xff] %v627_v58  ;;  %v586_v60 = vrot.slane %v522_v59, %v564_v46  ;;  %v607_v61 = vrot.slane %v543_v15, %v564_v46 }
 0x2e5   :  { %v626_v7 = vmul.f32 %v586_v60, %v789_v2  ;;  %v629_v1 = vmul.f32 %v607_v61, %v833_v34 }
 0x2e6   :  { %v536_v62 = vpop.permute.xlu1 %535 }
 0x2e7   :  { %634 = vst [vmem:[#allocation5 + $0x18] sm:$0xff] %v626_v7  ;;  %637 = vst [vmem:[#allocation5 + $0x30] sm:$0xff] %v629_v1  ;;  %v600_v63 = vrot.slane %v536_v62, %v564_v46 }
 0x2e9   :  { %v628_v4 = vmul.f32 %v600_v63, %v823_v26 }
 0x2ea   :  { %v550_v5 = vpop.permute.xlu1 %549 }
 0x2eb   :  { %636 = vst [vmem:[#allocation5 + $0x28] sm:$0xff] %v628_v4  ;;  %v614_v0 = vrot.slane %v550_v5, %v564_v46 }
 0x2ed   :  { %v630_v18 = vmul.f32 %v614_v0, %v843_v42 }
 0x2ef   :  { %638 = vst [vmem:[#allocation5 + $0x38] sm:$0xff] %v630_v18 }
 0x2f0   :  { %643 = vsyncadd [#allocation4], 768  ;;  %s753_s3 = smov [#allocation5]  }
 0x2f1   :  { %s644_s26 = sshll.u32 %s753_s3, 4  ;;  %s645_s26 = int_to_ptr.vmem [resolvable:$true] %s644_s26 }
 0x2f2   :  { %s723_s27 = scalar_lea.vmem %s645_s26, 256  ;;  %s727_s28 = scalar_lea.vmem %s645_s26, 1024 }
 0x2f3   :  { %p724_p5 = scmp.ne.s32.totalorder %s645_s26, %s723_s27  ;;  %p728_p6 = scmp.lt.s32.totalorder %s645_s26, %s645_s26 }
 0x2f4   :  { %p729_p7 = scmp.lt.s32.totalorder %s727_s28, %s723_s27 }
 0x2f6   :  { %p730_p8 = por %p729_p7, %p728_p6 }
 0x2f8   :  { %p731_p9 = pnand %p730_p8, %p724_p5 }
 0x2fa   :  { %734 = shalt.err (!%p731_p9)
}
 0x2fb   :  { %650 = dma.vmem_to_hbm [thread:$0]  %s645_s26, 256, %s929_s4, [#allocation4], %s748_s19, %s748_s19, %s749_s20  }
 0x2fc   :  { %745 = dma.done.wait [#allocation4], 1024  }
 0x2fd   :  { %746 = vsyncadd [#allocation4], 4294966272 }
 0x2fe   :  { %654 = vsyncpa [#allocation3], 1 }
 0x2ff   :  { %655 = vsyncpa [#allocation4], 1 }

</bundles_post_ra>
